<compile_context>
chip_gen: v7x
topology: tpu7x:2x2x1
jax: 0.10.0
libtpu: 0.0.40
codegen_flags: <defaults>
</compile_context>

<pallas_src>
import functools

import jax
import jax.numpy as jnp
from jax.experimental import pallas as pl
from jax.experimental.pallas import tpu as pltpu


_EPS = 1e-5
# Per-step VMEM budget for the (input + output) x double-buffer footprint.
# 8 MiB keeps us inside the scoped-VMEM defaults on every generation
# (v5e: 16 MiB, v6e/v7x: 32 MiB) while giving multi-MiB blocks.
_VMEM_TILE_BUDGET = 8 * 1024 * 1024


# ----------------------------------------------------------------------------
# tiling helpers
# ----------------------------------------------------------------------------
def _sublane_multiple(dtype):
    """Row-tile alignment respecting sublane packing: 8 (4B), 16 (2B), 32 (1B)."""
    return {4: 8, 2: 16, 1: 32}.get(jnp.dtype(dtype).itemsize, 8)


def _choose_tile(total, multiple, other_dim, itemsize, *,
                 vmem_budget_bytes=_VMEM_TILE_BUDGET, min_steps=2):
    """Pick a tile size along a dimension of extent `total`.

    Guarantees:
      * tile is a multiple of `multiple` unless it spans the whole dimension,
      * 2 arrays (in + out) x 2 buffers x tile x other_dim x itemsize fits
        `vmem_budget_bytes`,
      * the resulting grid has >= `min_steps` steps when the problem is large
        enough (so both v7x TensorCores get work under "parallel" semantics).
    """
    max_tile = max(multiple,
                   (vmem_budget_bytes // (4 * other_dim * itemsize))
                   // multiple * multiple)
    if total <= multiple or (total <= max_tile and total < min_steps * multiple):
        return total                                   # one full (possibly odd) block
    tile = min(total, max_tile)
    if min_steps > 1 and total >= min_steps * multiple:
        tile = min(tile, -(-total // min_steps))       # ceil(total / min_steps)
    return max(multiple, (tile // multiple) * multiple)


# ----------------------------------------------------------------------------
# kernel bodies
# ----------------------------------------------------------------------------
def _withbias_ln_lastdim_kernel(x_ref, w_ref, b_ref, o_ref, *, eps):
    """LayerNorm over the last (lane) axis of a (TR, C) tile.

    Two-pass statistics in f32 (robust; the tile is VMEM-resident so the
    second pass is free in HBM terms)."""
    x = x_ref[...].astype(jnp.float32)                 # (TR, C)
    mu = jnp.mean(x, axis=-1, keepdims=True)           # (TR, 1)
    xc = x - mu
    var = jnp.mean(xc * xc, axis=-1, keepdims=True)    # unbiased=False
    inv = jax.lax.rsqrt(var + eps)
    w = w_ref[...].astype(jnp.float32)                 # (1, C)
    b = b_ref[...].astype(jnp.float32)                 # (1, C)
    o_ref[...] = (xc * inv * w + b).astype(o_ref.dtype)


def _withbias_ln_chfirst_kernel(x_ref, w_ref, b_ref, o_ref, *, eps):
    """LayerNorm over the channel (sublane) axis of a (1, C, TN) tile.

    The lane axis carries flattened spatial (multiple of 128), so loads,
    stores and the reduction are lane-dense even when C is small (e.g. 48)."""
    x = x_ref[0].astype(jnp.float32)                   # (C, TN)
    mu = jnp.mean(x, axis=0, keepdims=True)            # (1, TN)
    xc = x - mu
    var = jnp.mean(xc * xc, axis=0, keepdims=True)
    inv = jax.lax.rsqrt(var + eps)
    w = w_ref[...].astype(jnp.float32)                 # (C, 1) -> bcast over lanes
    b = b_ref[...].astype(jnp.float32)
    o_ref[0] = (xc * inv * w + b).astype(o_ref.dtype)


# ----------------------------------------------------------------------------
# wrappers
# ----------------------------------------------------------------------------
def withbias_layernorm(x, weight, bias, *, eps=_EPS):
    """Exact interface of the PyTorch module: normalize the last dim of x.

    Note: for small C (e.g. lfdiff's C=48) on NCHW feature maps, prefer
    `withbias_layernorm_channels_first`, which is fully lane-dense with zero
    re-layout cost.  This generic wrapper keeps C on the lane axis because
    that is the HBM layout of the input; adding wrapper transposes would
    double HBM traffic on a bandwidth-bound op."""
    C = x.shape[-1]
    assert weight.shape == (C,) and bias.shape == (C,)
    R = 1
    for d in x.shape[:-1]:
        R *= d
    x2 = x.reshape(R, C)

    itemsize = jnp.dtype(x.dtype).itemsize
    mult = _sublane_multiple(x.dtype)
    TR = _choose_tile(R, mult, C, itemsize, min_steps=2)
    grid = (pl.cdiv(R, TR),)

    out = pl.pallas_call(
        functools.partial(_withbias_ln_lastdim_kernel, eps=eps),
        out_shape=jax.ShapeDtypeStruct((R, C), x.dtype),
        grid=grid,
        in_specs=[pl.BlockSpec((TR, C), lambda i: (i, 0)),
                  pl.BlockSpec((1, C), lambda i: (0, 0)),
                  pl.BlockSpec((1, C), lambda i: (0, 0))],
        out_specs=pl.BlockSpec((TR, C), lambda i: (i, 0)),
        compiler_params=pltpu.CompilerParams(
            dimension_semantics=("parallel",),
            vmem_limit_bytes=32 * 1024 * 1024),
    )(x2, weight.reshape(1, C), bias.reshape(1, C))
    return out.reshape(x.shape)


def withbias_layernorm_channels_first(x, weight, bias, *, eps=_EPS):
    """Same math on (B, C, *spatial) directly (normalize over axis 1).

    Numerically identical to to_4d(WithBias_LayerNorm(to_3d(x))) in lfdiff:
    channels on sublanes, flattened spatial on the 128-lane axis.  This is
    the lane-dense path and the recommended one for small C."""
    B, C = x.shape[0], x.shape[1]
    assert weight.shape == (C,) and bias.shape == (C,)
    N = 1
    for d in x.shape[2:]:
        N *= d
    x3 = x.reshape(B, C, N)

    itemsize = jnp.dtype(x.dtype).itemsize
    # Lane-axis tile: multiple of 128.  Only force a spatial split for the
    # v7x megacore when the batch axis alone cannot provide >= 2 grid steps.
    min_steps = 1 if B >= 2 else 2
    TN = _choose_tile(N, 128, C, itemsize, min_steps=min_steps)
    grid = (B, pl.cdiv(N, TN))

    out = pl.pallas_call(
        functools.partial(_withbias_ln_chfirst_kernel, eps=eps),
        out_shape=jax.ShapeDtypeStruct((B, C, N), x.dtype),
        grid=grid,
        in_specs=[pl.BlockSpec((1, C, TN), lambda b, j: (b, 0, j)),
                  pl.BlockSpec((C, 1), lambda b, j: (0, 0)),
                  pl.BlockSpec((C, 1), lambda b, j: (0, 0))],
        out_specs=pl.BlockSpec((1, C, TN), lambda b, j: (b, 0, j)),
        compiler_params=pltpu.CompilerParams(
            dimension_semantics=("parallel", "parallel"),
            vmem_limit_bytes=32 * 1024 * 1024),
    )(x3, weight.reshape(C, 1), bias.reshape(C, 1))
    return out.reshape(x.shape)


# ----------------------------------------------------------------------------
# pure-JAX reference (mirrors the torch forward exactly)
# ----------------------------------------------------------------------------
def layernorm_ref(x, w, b, eps=_EPS):
    mu = jnp.mean(x, axis=-1, keepdims=True)
    var = jnp.mean((x - mu) ** 2, axis=-1, keepdims=True)   # unbiased=False
    return (x - mu) / jnp.sqrt(var + eps) * w + b


if __name__ == "__main__":
    key = jax.random.PRNGKey(0)
    kx, kw, kb, kn = jax.random.split(key, 4)

    # Shapes consistent with lfdiff usage: tokens = H*W = 16*16, channels = 48.
    B, H, W, C = 2, 16, 16, 48
    HW = H * W
    x = jax.random.normal(kx, (B, HW, C), jnp.float32)
    w = 1.0 + 0.1 * jax.random.normal(kw, (C,), jnp.float32)
    b = 0.05 * jax.random.normal(kb, (C,), jnp.float32)

    # 1) exact-spec interface (normalize last dim)
    ln = jax.jit(withbias_layernorm)
    y = ln(x, w, b)
    jax.block_until_ready(y)
    y_ref = layernorm_ref(x, w, b)
    assert y.shape == x.shape and y.dtype == x.dtype
    assert bool(jnp.all(jnp.isfinite(y)))
    assert bool(jnp.allclose(y, y_ref, atol=1e-4, rtol=1e-4)), \
        float(jnp.max(jnp.abs(y - y_ref)))

    # 2) lane-dense channels-first path (the lfdiff NCHW usage, C=48)
    x_nchw = jax.random.normal(kn, (B, C, H, W), jnp.float32)
    ln_cf = jax.jit(withbias_layernorm_channels_first)
    y_cf = ln_cf(x_nchw, w, b)
    jax.block_until_ready(y_cf)
    ref_cf = jnp.moveaxis(
        layernorm_ref(jnp.moveaxis(x_nchw.reshape(B, C, HW), 1, -1), w, b),
        -1, 1).reshape(B, C, H, W)
    assert bool(jnp.allclose(y_cf, ref_cf, atol=1e-4, rtol=1e-4))

    # 3) remainder blocks: R not a multiple of the row tile / alignment
    x_odd = jax.random.normal(kx, (1, 100, C), jnp.float32)
    y_odd = withbias_layernorm(x_odd, w, b)
    jax.block_until_ready(y_odd)
    assert bool(jnp.allclose(y_odd, layernorm_ref(x_odd, w, b),
                             atol=1e-4, rtol=1e-4))

    # 4) bf16 in / bf16 out (stats in f32, 16-row tile alignment)
    y_bf16 = ln(x.astype(jnp.bfloat16), w, b)
    jax.block_until_ready(y_bf16)
    assert y_bf16.dtype == jnp.bfloat16
    assert bool(jnp.allclose(y_bf16.astype(jnp.float32), y_ref,
                             atol=5e-2, rtol=5e-2))

    print("KERNEL_OK")
</pallas_src>

<mosaic_0001>
module attributes {stable_mosaic.version = 11 : i64} {
  func.func @_withbias_ln_lastdim_kernel(%arg0: i32, %arg1: memref<256x48xf32, #tpu.memory_space<vmem>>, %arg2: memref<1x48xf32, #tpu.memory_space<vmem>>, %arg3: memref<1x48xf32, #tpu.memory_space<vmem>>, %arg4: memref<256x48xf32, #tpu.memory_space<vmem>>) attributes {dimension_semantics = [#tpu.dimension_semantics<parallel>], iteration_bounds = array<i64: 2>, scalar_prefetch = 0 : i64, scratch_operands = 0 : i64, tpu.core_type = #tpu.core_type<tc>, window_params = [{transform_indices = @transform_0, window_bounds = array<i64: 256, 48>}, {pipeline_mode = #tpu.pipeline_mode<synchronous>, transform_indices = @transform_1, window_bounds = array<i64: 1, 48>}, {pipeline_mode = #tpu.pipeline_mode<synchronous>, transform_indices = @transform_2, window_bounds = array<i64: 1, 48>}, {transform_indices = @transform_3, window_bounds = array<i64: 256, 48>}]} {
    %c0 = arith.constant 0 : index
    %c0_0 = arith.constant 0 : index
    %0 = vector.load %arg1[%c0, %c0_0] : memref<256x48xf32, #tpu.memory_space<vmem>>, vector<256x48xf32>
    %cst = arith.constant dense<0.000000e+00> : vector<256xf32>
    %1 = vector.multi_reduction <add>, %0, %cst [1] : vector<256x48xf32> to vector<256xf32>
    %2 = vector.shape_cast %1 : vector<256xf32> to vector<256x1xf32>
    %cst_1 = arith.constant 4.800000e+01 : f32
    %3 = vector.broadcast %cst_1 : f32 to vector<256x1xf32>
    %4 = arith.divf %2, %3 : vector<256x1xf32>
    %5 = vector.broadcast %4 : vector<256x1xf32> to vector<256x48xf32>
    %6 = arith.subf %0, %5 : vector<256x48xf32>
    %7 = arith.mulf %6, %6 : vector<256x48xf32>
    %cst_2 = arith.constant dense<0.000000e+00> : vector<256xf32>
    %8 = vector.multi_reduction <add>, %7, %cst_2 [1] : vector<256x48xf32> to vector<256xf32>
    %9 = vector.shape_cast %8 : vector<256xf32> to vector<256x1xf32>
    %cst_3 = arith.constant 4.800000e+01 : f32
    %10 = vector.broadcast %cst_3 : f32 to vector<256x1xf32>
    %11 = arith.divf %9, %10 : vector<256x1xf32>
    %cst_4 = arith.constant 9.99999974E-6 : f32
    %12 = vector.broadcast %cst_4 : f32 to vector<256x1xf32>
    %13 = arith.addf %11, %12 : vector<256x1xf32>
    %14 = math.rsqrt %13 : vector<256x1xf32>
    %c0_5 = arith.constant 0 : index
    %c0_6 = arith.constant 0 : index
    %15 = vector.load %arg2[%c0_5, %c0_6] : memref<1x48xf32, #tpu.memory_space<vmem>>, vector<1x48xf32>
    %c0_7 = arith.constant 0 : index
    %c0_8 = arith.constant 0 : index
    %16 = vector.load %arg3[%c0_7, %c0_8] : memref<1x48xf32, #tpu.memory_space<vmem>>, vector<1x48xf32>
    %17 = vector.broadcast %14 : vector<256x1xf32> to vector<256x48xf32>
    %18 = arith.mulf %6, %17 : vector<256x48xf32>
    %19 = vector.broadcast %15 : vector<1x48xf32> to vector<256x48xf32>
    %20 = arith.mulf %18, %19 : vector<256x48xf32>
    %21 = vector.broadcast %16 : vector<1x48xf32> to vector<256x48xf32>
    %22 = arith.addf %20, %21 : vector<256x48xf32>
    %c0_9 = arith.constant 0 : index
    %c0_10 = arith.constant 0 : index
    %23 = vector.load %arg4[%c0_9, %c0_10] : memref<256x48xf32, #tpu.memory_space<vmem>>, vector<256x48xf32>
    tpu.vector_store %arg4[%c0_9, %c0_10], %22 {strides = array<i32>} : memref<256x48xf32, #tpu.memory_space<vmem>>, vector<256x48xf32>,
    return
  }
  func.func @transform_0(%arg0: i32) -> (i32, i32) {
    %c0_i32 = arith.constant 0 : i32
    %c0_i32_0 = arith.constant 0 : i32
    return %arg0, %c0_i32 : i32, i32
  }
  func.func @transform_1(%arg0: i32) -> (i32, i32) {
    %c0_i32 = arith.constant 0 : i32
    %c0_i32_0 = arith.constant 0 : i32
    %c0_i32_1 = arith.constant 0 : i32
    return %c0_i32, %c0_i32_0 : i32, i32
  }
  func.func @transform_2(%arg0: i32) -> (i32, i32) {
    %c0_i32 = arith.constant 0 : i32
    %c0_i32_0 = arith.constant 0 : i32
    %c0_i32_1 = arith.constant 0 : i32
    return %c0_i32, %c0_i32_0 : i32, i32
  }
  func.func @transform_3(%arg0: i32) -> (i32, i32) {
    %c0_i32 = arith.constant 0 : i32
    %c0_i32_0 = arith.constant 0 : i32
    return %arg0, %c0_i32 : i32, i32
  }
}

</mosaic_0001>

<bundles_post_ra>
// kernel: withbias_layernorm.1
= control target key start
LH: loop header
LB: loop body
LE: loop exit
PB: predicated region body
PF: predicated region fallthrough
CT: control target
= control target key end

     0   :  { %s903_s12 = smov 0   ;;  %s1453_s0 = inlined_call_operand.vmem [shape: f32[512,48], index: 0, kind: input, shape index: {}]   ;;  %s1454_s1 = inlined_call_operand.vmem [shape: f32[1,48], index: 1, kind: input, shape index: {}]   ;;  %s1455_s2 = inlined_call_operand.vmem [shape: f32[1,48], index: 2, kind: input, shape index: {}]   ;;  %s1456_s3 = inlined_call_operand.vmem [shape: f32[512,48], index: 3, kind: output, shape index: {}]  }
   0x1 LB: > { %s790_s13 = sadd.s32 4294967295, %s881_s12   ;;  %p794_p0 = scmp.ge.s32.totalorder %s881_s12, 1  ;;  %s881_s12 = sphi %s903_s12, %s13_s12  }
   0x2   : > { %p138_p1 = scmp.lt.s32.totalorder %s881_s12, 3 }
   0x4   : > { %p139_p2 = pnand %p794_p0, %p138_p1 }
   0x5   : > { %s795_s14 = sshll.u32 (!%p139_p2), %s790_s13, 5  ;;  %vm206_vm0 = vcmask (!%p139_p2), 392192  }
   0x6   : > { %142 = sbr.rel (%p139_p2) target bundleno = 395 (0x18b), region = 32  ;;  %p163_p3 = scmp.lt.s32.totalorder (!%p139_p2), %s795_s14, 63 }
   0xd   : > { %s1458_s14 = smov (!%p163_p3, %s795_s14), 63 }
   0xe   : > { %s796_s15 = sshll.u32 %s1458_s14, 3 }
   0xf   : > { %s919_s18 = scalar_lea.vmem %s1453_s0, %s796_s15  ;;  %s1290_s25 = scalar_lea.vmem %s1456_s3, %s796_s15 }
  0x10   : > { %v922_v0 = vld [vmem:[%s919_s18] sm:$0xff]  ;;  %v925_v1 = vld [vmem:[%s919_s18 + $0x10] sm:$0xff]  ;;  %v928_v2 = vld [vmem:[%s919_s18 + $0x8] sm:$0xff] }
  0x11   : > { %v207_v3 = vsel %vm206_vm0, %v922_v0, 0.0  ;;  %v213_v4 = vsel %vm206_vm0, %v925_v1, 0.0  ;;  %v935_v5 = vld [vmem:[%s919_s18 + $0x18] sm:$0xff]  ;;  %v210_v6 = vsel %vm206_vm0, %v928_v2, 0.0  ;;  %v942_v8 = vld [vmem:[%s919_s18 + $0x20] sm:$0xff]  ;;  %v945_v9 = vld [vmem:[%s919_s18 + $0x28] sm:$0xff] }
  0x12   : > { %208 = vadd.xlane.f32.xlu0 %v207_v3  ;;  %214 = vadd.xlane.f32.xlu1 %v213_v4  ;;  %v216_v7 = vsel %vm206_vm0, %v935_v5, 0.0  ;;  %v219_v10 = vsel %vm206_vm0, %v942_v8, 0.0  ;;  %v222_v11 = vsel %vm206_vm0, %v945_v9, 0.0  ;;  %v952_v12 = vld [vmem:[%s919_s18 + $0x30] sm:$0xff]  ;;  %v955_v13 = vld [vmem:[%s919_s18 + $0x38] sm:$0xff]  ;;  %v962_v16 = vld [vmem:[%s919_s18 + $0x40] sm:$0xff] }
  0x13   : > { %v225_v14 = vsel %vm206_vm0, %v952_v12, 0.0  ;;  %v228_v15 = vsel %vm206_vm0, %v955_v13, 0.0  ;;  %v965_v17 = vld [vmem:[%s919_s18 + $0x48] sm:$0xff]  ;;  %v231_v18 = vsel %vm206_vm0, %v962_v16, 0.0  ;;  %v972_v20 = vld [vmem:[%s919_s18 + $0x50] sm:$0xff]  ;;  %v975_v21 = vld [vmem:[%s919_s18 + $0x58] sm:$0xff] }
  0x14   : > { %v234_v19 = vsel %vm206_vm0, %v965_v17, 0.0  ;;  %v237_v22 = vsel %vm206_vm0, %v972_v20, 0.0  ;;  %v240_v23 = vsel %vm206_vm0, %v975_v21, 0.0  ;;  %v982_v24 = vld [vmem:[%s919_s18 + $0x60] sm:$0xff]  ;;  %v985_v25 = vld [vmem:[%s919_s18 + $0x68] sm:$0xff]  ;;  %v992_v28 = vld [vmem:[%s919_s18 + $0x70] sm:$0xff] }
  0x15   : > { %v243_v26 = vsel %vm206_vm0, %v982_v24, 0.0  ;;  %v246_v27 = vsel %vm206_vm0, %v985_v25, 0.0  ;;  %v995_v29 = vld [vmem:[%s919_s18 + $0x78] sm:$0xff]  ;;  %v249_v30 = vsel %vm206_vm0, %v992_v28, 0.0  ;;  %v1002_v32 = vld [vmem:[%s919_s18 + $0x80] sm:$0xff]  ;;  %v1005_v33 = vld [vmem:[%s919_s18 + $0x88] sm:$0xff] }
  0x16   : > { %211 = vadd.xlane.f32.xlu0 %v210_v6  ;;  %217 = vadd.xlane.f32.xlu1 %v216_v7  ;;  %v252_v31 = vsel %vm206_vm0, %v995_v29, 0.0  ;;  %v255_v34 = vsel %vm206_vm0, %v1002_v32, 0.0  ;;  %v258_v35 = vsel %vm206_vm0, %v1005_v33, 0.0  ;;  %v1012_v36 = vld [vmem:[%s919_s18 + $0x90] sm:$0xff]  ;;  %v1015_v37 = vld [vmem:[%s919_s18 + $0x98] sm:$0xff]  ;;  %v1022_v40 = vld [vmem:[%s919_s18 + $0xa0] sm:$0xff] }
  0x17   : > { %v261_v38 = vsel %vm206_vm0, %v1012_v36, 0.0  ;;  %v264_v39 = vsel %vm206_vm0, %v1015_v37, 0.0  ;;  %v1025_v41 = vld [vmem:[%s919_s18 + $0xa8] sm:$0xff]  ;;  %v267_v42 = vsel %vm206_vm0, %v1022_v40, 0.0  ;;  %v1032_v44 = vld [vmem:[%s919_s18 + $0xb0] sm:$0xff]  ;;  %v1035_v45 = vld [vmem:[%s919_s18 + $0xb8] sm:$0xff] }
  0x18   : > { %v270_v43 = vsel %vm206_vm0, %v1025_v41, 0.0  ;;  %v273_v46 = vsel %vm206_vm0, %v1032_v44, 0.0  ;;  %v276_v47 = vsel %vm206_vm0, %v1035_v45, 0.0  ;;  %v1042_v48 = vld [vmem:[%s919_s18 + $0xc0] sm:$0xff]  ;;  %v1045_v49 = vld [vmem:[%s919_s18 + $0xc8] sm:$0xff]  ;;  %v1052_v52 = vld [vmem:[%s919_s18 + $0xd0] sm:$0xff] }
  0x19   : > { %v279_v50 = vsel %vm206_vm0, %v1042_v48, 0.0  ;;  %v282_v51 = vsel %vm206_vm0, %v1045_v49, 0.0  ;;  %v1055_v53 = vld [vmem:[%s919_s18 + $0xd8] sm:$0xff]  ;;  %v285_v54 = vsel %vm206_vm0, %v1052_v52, 0.0  ;;  %v1062_v56 = vld [vmem:[%s919_s18 + $0xe0] sm:$0xff]  ;;  %v1065_v57 = vld [vmem:[%s919_s18 + $0xe8] sm:$0xff] }
  0x1a   : > { %220 = vadd.xlane.f32.xlu0 %v219_v10  ;;  %223 = vadd.xlane.f32.xlu1 %v222_v11  ;;  %v288_v55 = vsel %vm206_vm0, %v1055_v53, 0.0  ;;  %v291_v58 = vsel %vm206_vm0, %v1062_v56, 0.0  ;;  %v294_v59 = vsel %vm206_vm0, %v1065_v57, 0.0  ;;  %v1072_v60 = vld [vmem:[%s919_s18 + $0xf0] sm:$0xff]  ;;  %v1075_v61 = vld [vmem:[%s919_s18 + $0xf8] sm:$0xff] }
  0x1b   : > { %v297_v62 = vsel %vm206_vm0, %v1072_v60, 0.0  ;;  %v300_v63 = vsel %vm206_vm0, %v1075_v61, 0.0 }
  0x1e   : > { %226 = vadd.xlane.f32.xlu0 %v225_v14  ;;  %229 = vadd.xlane.f32.xlu1 %v228_v15 }
  0x22   : > { %232 = vadd.xlane.f32.xlu0 %v231_v18  ;;  %235 = vadd.xlane.f32.xlu1 %v234_v19 }
  0x26   : > { %238 = vadd.xlane.f32.xlu0 %v237_v22  ;;  %241 = vadd.xlane.f32.xlu1 %v240_v23 }
  0x2a   : > { %244 = vadd.xlane.f32.xlu0 %v243_v26  ;;  %247 = vadd.xlane.f32.xlu1 %v246_v27 }
  0x2e   : > { %250 = vadd.xlane.f32.xlu0 %v249_v30  ;;  %253 = vadd.xlane.f32.xlu1 %v252_v31 }
  0x32   : > { %256 = vadd.xlane.f32.xlu0 %v255_v34  ;;  %259 = vadd.xlane.f32.xlu1 %v258_v35 }
  0x36   : > { %262 = vadd.xlane.f32.xlu0 %v261_v38  ;;  %265 = vadd.xlane.f32.xlu1 %v264_v39 }
  0x3a   : > { %268 = vadd.xlane.f32.xlu0 %v267_v42  ;;  %271 = vadd.xlane.f32.xlu1 %v270_v43 }
  0x3e   : > { %274 = vadd.xlane.f32.xlu0 %v273_v46  ;;  %277 = vadd.xlane.f32.xlu1 %v276_v47 }
  0x42   : > { %280 = vadd.xlane.f32.xlu0 %v279_v50  ;;  %283 = vadd.xlane.f32.xlu1 %v282_v51 }
  0x46   : > { %286 = vadd.xlane.f32.xlu0 %v285_v54  ;;  %289 = vadd.xlane.f32.xlu1 %v288_v55 }
  0x4a   : > { %292 = vadd.xlane.f32.xlu0 %v291_v58  ;;  %295 = vadd.xlane.f32.xlu1 %v294_v59 }
  0x4e   : > { %298 = vadd.xlane.f32.xlu0 %v297_v62  ;;  %301 = vadd.xlane.f32.xlu1 %v300_v63 }
  0x9f   : > { %v209_v3 = vpop.xlane.xlu0 %208  ;;  %v215_v4 = vpop.xlane.xlu1 %214 }
  0xa0   : > { %v304_v6 = vmul.f32 0.020833334, %v209_v3  ;;  %v306_v7 = vmul.f32 0.020833334, %v215_v4 }
  0xa2   : > { %v1082_v10 = vsub.f32 %v922_v0, %v304_v6  ;;  %v1085_v11 = vsub.f32 %v925_v1, %v306_v7 }
  0xa3   : > { %v212_v14 = vpop.xlane.xlu0 %211  ;;  %v218_v15 = vpop.xlane.xlu1 %217 }
  0xa4   : > { %v305_v18 = vmul.f32 0.020833334, %v212_v14  ;;  %v307_v19 = vmul.f32 0.020833334, %v218_v15  ;;  %v368_v22 = vmul.f32 %v1082_v10, %v1082_v10  ;;  %v370_v23 = vmul.f32 %v1085_v11, %v1085_v11 }
  0xa6   : > { %v1092_v26 = vsub.f32 %v928_v2, %v305_v18  ;;  %v1095_v27 = vsub.f32 %v935_v5, %v307_v19  ;;  %v400_v0 = vsel %vm206_vm0, %v368_v22, 0.0  ;;  %v406_v31 = vsel %vm206_vm0, %v370_v23, 0.0 }
  0xa7   : > { %401 = vadd.xlane.f32.xlu0 %v400_v0  ;;  %v221_v1 = vpop.xlane.xlu0 %220  ;;  %v224_v30 = vpop.xlane.xlu1 %223 }
  0xa8   : > { %v308_v34 = vmul.f32 0.020833334, %v221_v1  ;;  %v309_v35 = vmul.f32 0.020833334, %v224_v30  ;;  %v369_v38 = vmul.f32 %v1092_v26, %v1092_v26  ;;  %v371_v39 = vmul.f32 %v1095_v27, %v1095_v27 }
  0xaa   : > { %v1104_v2 = vsub.f32 %v942_v8, %v308_v34  ;;  %v1107_v5 = vsub.f32 %v945_v9, %v309_v35  ;;  %v403_v42 = vsel %vm206_vm0, %v369_v38, 0.0  ;;  %v409_v47 = vsel %vm206_vm0, %v371_v39, 0.0 }
  0xab   : > { %407 = vadd.xlane.f32.xlu0 %v406_v31  ;;  %404 = vadd.xlane.f32.xlu1 %v403_v42  ;;  %v227_v43 = vpop.xlane.xlu0 %226  ;;  %v230_v46 = vpop.xlane.xlu1 %229 }
  0xac   : > { %v310_v50 = vmul.f32 0.020833334, %v227_v43  ;;  %v311_v51 = vmul.f32 0.020833334, %v230_v46  ;;  %v372_v54 = vmul.f32 %v1104_v2, %v1104_v2  ;;  %v373_v8 = vmul.f32 %v1107_v5, %v1107_v5 }
  0xae   : > { %v1116_v55 = vsub.f32 %v952_v12, %v310_v50  ;;  %v1119_v9 = vsub.f32 %v955_v13, %v311_v51  ;;  %v412_v58 = vsel %vm206_vm0, %v372_v54, 0.0  ;;  %v415_v63 = vsel %vm206_vm0, %v373_v8, 0.0 }
  0xaf   : > { %410 = vadd.xlane.f32.xlu1 %v409_v47  ;;  %413 = vadd.xlane.f32.xlu0 %v412_v58  ;;  %v233_v59 = vpop.xlane.xlu0 %232  ;;  %v236_v62 = vpop.xlane.xlu1 %235 }
  0xb0   : > { %v312_v3 = vmul.f32 0.020833334, %v233_v59  ;;  %v313_v4 = vmul.f32 0.020833334, %v236_v62  ;;  %v374_v6 = vmul.f32 %v1116_v55, %v1116_v55  ;;  %v375_v12 = vmul.f32 %v1119_v9, %v1119_v9 }
  0xb2   : > { %v1128_v7 = vsub.f32 %v962_v16, %v312_v3  ;;  %v1131_v13 = vsub.f32 %v965_v17, %v313_v4  ;;  %v418_v14 = vsel %vm206_vm0, %v374_v6, 0.0  ;;  %v421_v19 = vsel %vm206_vm0, %v375_v12, 0.0 }
  0xb3   : > { %416 = vadd.xlane.f32.xlu1 %v415_v63  ;;  %419 = vadd.xlane.f32.xlu0 %v418_v14  ;;  %v239_v15 = vpop.xlane.xlu0 %238  ;;  %v242_v18 = vpop.xlane.xlu1 %241 }
  0xb4   : > { %v314_v22 = vmul.f32 0.020833334, %v239_v15  ;;  %v315_v23 = vmul.f32 0.020833334, %v242_v18  ;;  %v376_v0 = vmul.f32 %v1128_v7, %v1128_v7  ;;  %v377_v16 = vmul.f32 %v1131_v13, %v1131_v13 }
  0xb6   : > { %v1140_v1 = vsub.f32 %v972_v20, %v314_v22  ;;  %v1143_v17 = vsub.f32 %v975_v21, %v315_v23  ;;  %v424_v30 = vsel %vm206_vm0, %v376_v0, 0.0  ;;  %v427_v35 = vsel %vm206_vm0, %v377_v16, 0.0 }
  0xb7   : > { %422 = vadd.xlane.f32.xlu1 %v421_v19  ;;  %425 = vadd.xlane.f32.xlu0 %v424_v30  ;;  %v245_v31 = vpop.xlane.xlu0 %244  ;;  %v248_v34 = vpop.xlane.xlu1 %247 }
  0xb8   : > { %v316_v38 = vmul.f32 0.020833334, %v245_v31  ;;  %v317_v39 = vmul.f32 0.020833334, %v248_v34  ;;  %v378_v42 = vmul.f32 %v1140_v1, %v1140_v1  ;;  %v379_v20 = vmul.f32 %v1143_v17, %v1143_v17 }
  0xba   : > { %v1152_v43 = vsub.f32 %v982_v24, %v316_v38  ;;  %v1155_v21 = vsub.f32 %v985_v25, %v317_v39  ;;  %v430_v46 = vsel %vm206_vm0, %v378_v42, 0.0  ;;  %v433_v51 = vsel %vm206_vm0, %v379_v20, 0.0 }
  0xbb   : > { %428 = vadd.xlane.f32.xlu1 %v427_v35  ;;  %431 = vadd.xlane.f32.xlu0 %v430_v46  ;;  %v251_v47 = vpop.xlane.xlu0 %250  ;;  %v254_v50 = vpop.xlane.xlu1 %253 }
  0xbc   : > { %v318_v54 = vmul.f32 0.020833334, %v251_v47  ;;  %v319_v8 = vmul.f32 0.020833334, %v254_v50  ;;  %v380_v58 = vmul.f32 %v1152_v43, %v1152_v43  ;;  %v381_v24 = vmul.f32 %v1155_v21, %v1155_v21 }
  0xbe   : > { %v1164_v59 = vsub.f32 %v992_v28, %v318_v54  ;;  %v1167_v25 = vsub.f32 %v995_v29, %v319_v8  ;;  %v436_v62 = vsel %vm206_vm0, %v380_v58, 0.0  ;;  %v439_v4 = vsel %vm206_vm0, %v381_v24, 0.0 }
  0xbf   : > { %434 = vadd.xlane.f32.xlu1 %v433_v51  ;;  %437 = vadd.xlane.f32.xlu0 %v436_v62  ;;  %v257_v63 = vpop.xlane.xlu0 %256  ;;  %v260_v3 = vpop.xlane.xlu1 %259 }
  0xc0   : > { %v320_v6 = vmul.f32 0.020833334, %v257_v63  ;;  %v321_v12 = vmul.f32 0.020833334, %v260_v3  ;;  %v382_v14 = vmul.f32 %v1164_v59, %v1164_v59  ;;  %v383_v28 = vmul.f32 %v1167_v25, %v1167_v25 }
  0xc2   : > { %v1176_v15 = vsub.f32 %v1002_v32, %v320_v6  ;;  %v1179_v29 = vsub.f32 %v1005_v33, %v321_v12  ;;  %v442_v18 = vsel %vm206_vm0, %v382_v14, 0.0  ;;  %v445_v23 = vsel %vm206_vm0, %v383_v28, 0.0 }
  0xc3   : > { %440 = vadd.xlane.f32.xlu1 %v439_v4  ;;  %443 = vadd.xlane.f32.xlu0 %v442_v18  ;;  %v263_v19 = vpop.xlane.xlu0 %262  ;;  %v266_v22 = vpop.xlane.xlu1 %265 }
  0xc4   : > { %v322_v0 = vmul.f32 0.020833334, %v263_v19  ;;  %v323_v16 = vmul.f32 0.020833334, %v266_v22  ;;  %v384_v30 = vmul.f32 %v1176_v15, %v1176_v15  ;;  %v385_v32 = vmul.f32 %v1179_v29, %v1179_v29 }
  0xc6   : > { %v1188_v31 = vsub.f32 %v1012_v36, %v322_v0  ;;  %v1191_v33 = vsub.f32 %v1015_v37, %v323_v16  ;;  %v448_v34 = vsel %vm206_vm0, %v384_v30, 0.0  ;;  %v451_v39 = vsel %vm206_vm0, %v385_v32, 0.0 }
  0xc7   : > { %446 = vadd.xlane.f32.xlu1 %v445_v23  ;;  %449 = vadd.xlane.f32.xlu0 %v448_v34  ;;  %v269_v35 = vpop.xlane.xlu0 %268  ;;  %v272_v38 = vpop.xlane.xlu1 %271 }
  0xc8   : > { %v324_v42 = vmul.f32 0.020833334, %v269_v35  ;;  %v325_v20 = vmul.f32 0.020833334, %v272_v38  ;;  %v386_v46 = vmul.f32 %v1188_v31, %v1188_v31  ;;  %v387_v36 = vmul.f32 %v1191_v33, %v1191_v33 }
  0xca   : > { %v1200_v47 = vsub.f32 %v1022_v40, %v324_v42  ;;  %v1203_v37 = vsub.f32 %v1025_v41, %v325_v20  ;;  %v454_v50 = vsel %vm206_vm0, %v386_v46, 0.0  ;;  %v457_v8 = vsel %vm206_vm0, %v387_v36, 0.0 }
  0xcb   : > { %452 = vadd.xlane.f32.xlu1 %v451_v39  ;;  %455 = vadd.xlane.f32.xlu0 %v454_v50  ;;  %v275_v51 = vpop.xlane.xlu0 %274  ;;  %v278_v54 = vpop.xlane.xlu1 %277 }
  0xcc   : > { %v326_v58 = vmul.f32 0.020833334, %v275_v51  ;;  %v327_v24 = vmul.f32 0.020833334, %v278_v54  ;;  %v388_v62 = vmul.f32 %v1200_v47, %v1200_v47  ;;  %v389_v40 = vmul.f32 %v1203_v37, %v1203_v37 }
  0xce   : > { %v1212_v63 = vsub.f32 %v1032_v44, %v326_v58  ;;  %v1215_v41 = vsub.f32 %v1035_v45, %v327_v24  ;;  %v460_v3 = vsel %vm206_vm0, %v388_v62, 0.0  ;;  %v463_v12 = vsel %vm206_vm0, %v389_v40, 0.0 }
  0xcf   : > { %458 = vadd.xlane.f32.xlu1 %v457_v8  ;;  %461 = vadd.xlane.f32.xlu0 %v460_v3  ;;  %v281_v4 = vpop.xlane.xlu0 %280  ;;  %v284_v6 = vpop.xlane.xlu1 %283 }
  0xd0   : > { %v328_v14 = vmul.f32 0.020833334, %v281_v4  ;;  %v329_v28 = vmul.f32 0.020833334, %v284_v6  ;;  %v390_v18 = vmul.f32 %v1212_v63, %v1212_v63  ;;  %v391_v44 = vmul.f32 %v1215_v41, %v1215_v41 }
  0xd2   : > { %v1224_v19 = vsub.f32 %v1042_v48, %v328_v14  ;;  %v1227_v45 = vsub.f32 %v1045_v49, %v329_v28  ;;  %v466_v22 = vsel %vm206_vm0, %v390_v18, 0.0  ;;  %v469_v16 = vsel %vm206_vm0, %v391_v44, 0.0 }
  0xd3   : > { %464 = vadd.xlane.f32.xlu1 %v463_v12  ;;  %467 = vadd.xlane.f32.xlu0 %v466_v22  ;;  %v287_v23 = vpop.xlane.xlu0 %286  ;;  %v290_v0 = vpop.xlane.xlu1 %289 }
  0xd4   : > { %v330_v30 = vmul.f32 0.020833334, %v287_v23  ;;  %v331_v32 = vmul.f32 0.020833334, %v290_v0  ;;  %v392_v34 = vmul.f32 %v1224_v19, %v1224_v19  ;;  %v393_v48 = vmul.f32 %v1227_v45, %v1227_v45 }
  0xd6   : > { %v1236_v35 = vsub.f32 %v1052_v52, %v330_v30  ;;  %v1239_v49 = vsub.f32 %v1055_v53, %v331_v32  ;;  %v472_v38 = vsel %vm206_vm0, %v392_v34, 0.0  ;;  %v475_v20 = vsel %vm206_vm0, %v393_v48, 0.0 }
  0xd7   : > { %470 = vadd.xlane.f32.xlu1 %v469_v16  ;;  %473 = vadd.xlane.f32.xlu0 %v472_v38  ;;  %v293_v39 = vpop.xlane.xlu0 %292  ;;  %v296_v42 = vpop.xlane.xlu1 %295 }
  0xd8   : > { %v332_v46 = vmul.f32 0.020833334, %v293_v39  ;;  %v333_v36 = vmul.f32 0.020833334, %v296_v42  ;;  %v394_v50 = vmul.f32 %v1236_v35, %v1236_v35  ;;  %v395_v52 = vmul.f32 %v1239_v49, %v1239_v49 }
  0xda   : > { %v1248_v51 = vsub.f32 %v1062_v56, %v332_v46  ;;  %v1251_v53 = vsub.f32 %v1065_v57, %v333_v36  ;;  %v478_v54 = vsel %vm206_vm0, %v394_v50, 0.0  ;;  %v481_v24 = vsel %vm206_vm0, %v395_v52, 0.0 }
  0xdb   : > { %476 = vadd.xlane.f32.xlu1 %v475_v20  ;;  %479 = vadd.xlane.f32.xlu0 %v478_v54  ;;  %v299_v8 = vpop.xlane.xlu0 %298  ;;  %v302_v58 = vpop.xlane.xlu1 %301 }
  0xdc   : > { %v334_v62 = vmul.f32 0.020833334, %v299_v8  ;;  %v335_v40 = vmul.f32 0.020833334, %v302_v58  ;;  %v396_v3 = vmul.f32 %v1248_v51, %v1248_v51  ;;  %v397_v56 = vmul.f32 %v1251_v53, %v1251_v53  ;;  %v1276_v58 = vld [vmem:[%s1454_s1] ss:$0 sm:$0xff] }
  0xde   : > { %v1260_v4 = vsub.f32 %v1072_v60, %v334_v62  ;;  %v1263_v57 = vsub.f32 %v1075_v61, %v335_v40  ;;  %v484_v6 = vsel %vm206_vm0, %v396_v3, 0.0  ;;  %v487_v12 = vsel %vm206_vm0, %v397_v56, 0.0 }
  0xdf   : > { %482 = vadd.xlane.f32.xlu1 %v481_v24  ;;  %485 = vadd.xlane.f32.xlu0 %v484_v6  ;;  %v1282_v6 = vld [vmem:[%s1455_s2] ss:$0 sm:$0xff] }
  0xe0   : > { %v398_v14 = vmul.f32 %v1260_v4, %v1260_v4  ;;  %v399_v28 = vmul.f32 %v1263_v57, %v1263_v57 }
  0xe2   : > { %v490_v18 = vsel %vm206_vm0, %v398_v14, 0.0  ;;  %v493_v60 = vsel %vm206_vm0, %v399_v28, 0.0 }
  0xe3   : > { %488 = vadd.xlane.f32.xlu1 %v487_v12  ;;  %491 = vadd.xlane.f32.xlu0 %v490_v18 }
  0xe7   : > { %494 = vadd.xlane.f32.xlu1 %v493_v60 }
 0x134   : > { %v402_v61 = vpop.xlane.xlu0 %401 }
 0x135   : > { %v496_v44 = vmul.f32 0.020833334, %v402_v61 }
 0x137   : > { %v528_v22 = vadd.f32 1e-05, %v496_v44 }
 0x138   : > { %v405_v23 = vpop.xlane.xlu1 %404  ;;  %v408_v0 = vpop.xlane.xlu0 %407 }
 0x139   : > { %811 = vrsqrt.f32 %v528_v22  ;;  %v497_v16 = vmul.f32 0.020833334, %v405_v23  ;;  %v498_v30 = vmul.f32 0.020833334, %v408_v0 }
 0x13b   : > { %v529_v32 = vadd.f32 1e-05, %v497_v16  ;;  %v530_v34 = vadd.f32 1e-05, %v498_v30 }
 0x13c   : > { %v411_v48 = vpop.xlane.xlu1 %410  ;;  %v414_v38 = vpop.xlane.xlu0 %413 }
 0x13d   : > { %813 = vrsqrt.f32 %v529_v32  ;;  %v499_v39 = vmul.f32 0.020833334, %v411_v48  ;;  %v500_v42 = vmul.f32 0.020833334, %v414_v38 }
 0x13e   : > { %815 = vrsqrt.f32 %v530_v34 }
 0x13f   : > { %v531_v20 = vadd.f32 1e-05, %v499_v39  ;;  %v532_v46 = vadd.f32 1e-05, %v500_v42 }
 0x140   : > { %v417_v36 = vpop.xlane.xlu1 %416  ;;  %v420_v50 = vpop.xlane.xlu0 %419 }
 0x141   : > { %817 = vrsqrt.f32 %v531_v20  ;;  %v501_v52 = vmul.f32 0.020833334, %v417_v36  ;;  %v502_v54 = vmul.f32 0.020833334, %v420_v50 }
 0x142   : > { %819 = vrsqrt.f32 %v532_v46 }
 0x143   : > { %v812_v8 = vpop.eup %811  ;;  %v533_v24 = vadd.f32 1e-05, %v501_v52  ;;  %v534_v62 = vadd.f32 1e-05, %v502_v54 }
 0x144   : > { %v594_v40 = vmul.f32 %v812_v8, %v1082_v10  ;;  %v423_v3 = vpop.xlane.xlu1 %422  ;;  %v426_v56 = vpop.xlane.xlu0 %425 }
 0x145   : > { %821 = vrsqrt.f32 %v533_v24  ;;  %v503_v12 = vmul.f32 0.020833334, %v423_v3  ;;  %v504_v14 = vmul.f32 0.020833334, %v426_v56 }
 0x146   : > { %v632_v28 = vmul.f32 %v1276_v58, %v594_v40  ;;  %823 = vrsqrt.f32 %v534_v62 }
 0x147   : > { %v814_v18 = vpop.eup %813  ;;  %v535_v10 = vadd.f32 1e-05, %v503_v12  ;;  %v536_v60 = vadd.f32 1e-05, %v504_v14 }
 0x148   : > { %v816_v61 = vpop.eup %815  ;;  %v670_v44 = vadd.f32 %v1282_v6, %v632_v28  ;;  %v595_v22 = vmul.f32 %v814_v18, %v1092_v26  ;;  %v429_v23 = vpop.xlane.xlu1 %428 }
 0x149   : > { %v432_v0 = vpop.xlane.xlu0 %431  ;;  %v596_v16 = vmul.f32 %v816_v61, %v1085_v11  ;;  %825 = vrsqrt.f32 %v535_v10  ;;  %v505_v30 = vmul.f32 0.020833334, %v429_v23 }
 0x14a   : > { %v506_v32 = vmul.f32 0.020833334, %v432_v0  ;;  %702 = vst.msk [vmem:[%s1290_s25] sm:$0xff] %vm206_vm0, %v670_v44  ;;  %v633_v34 = vmul.f32 %v1276_v58, %v595_v22  ;;  %827 = vrsqrt.f32 %v536_v60 }
 0x14b   : > { %v818_v48 = vpop.eup %817  ;;  %v634_v38 = vmul.f32 %v1276_v58, %v596_v16  ;;  %v537_v39 = vadd.f32 1e-05, %v505_v30 }
 0x14c   : > { %v538_v42 = vadd.f32 1e-05, %v506_v32  ;;  %v820_v26 = vpop.eup %819  ;;  %v671_v20 = vadd.f32 %v1282_v6, %v633_v34  ;;  %v597_v11 = vmul.f32 %v818_v48, %v1095_v27  ;;  %v435_v46 = vpop.xlane.xlu1 %434 }
 0x14d   : > { %v438_v36 = vpop.xlane.xlu0 %437  ;;  %v672_v50 = vadd.f32 %v1282_v6, %v634_v38  ;;  %v598_v52 = vmul.f32 %v820_v26, %v1104_v2  ;;  %829 = vrsqrt.f32 %v537_v39  ;;  %v507_v54 = vmul.f32 0.020833334, %v435_v46 }
 0x14e   : > { %703 = vst.msk [vmem:[%s1290_s25 + $0x8] sm:$0xff] %vm206_vm0, %v671_v20  ;;  %v635_v8 = vmul.f32 %v1276_v58, %v597_v11  ;;  %831 = vrsqrt.f32 %v538_v42  ;;  %v508_v24 = vmul.f32 0.020833334, %v438_v36 }
 0x14f   : > { %v822_v62 = vpop.eup %821  ;;  %704 = vst.msk [vmem:[%s1290_s25 + $0x10] sm:$0xff] %vm206_vm0, %v672_v50  ;;  %v636_v27 = vmul.f32 %v1276_v58, %v598_v52  ;;  %v539_v40 = vadd.f32 1e-05, %v507_v54 }
 0x150   : > { %v824_v3 = vpop.eup %823  ;;  %v673_v56 = vadd.f32 %v1282_v6, %v635_v8  ;;  %v599_v2 = vmul.f32 %v822_v62, %v1107_v5  ;;  %v540_v12 = vadd.f32 1e-05, %v508_v24  ;;  %v441_v14 = vpop.xlane.xlu1 %440 }
 0x151   : > { %v444_v28 = vpop.xlane.xlu0 %443  ;;  %v674_v18 = vadd.f32 %v1282_v6, %v636_v27  ;;  %v600_v10 = vmul.f32 %v824_v3, %v1116_v55  ;;  %833 = vrsqrt.f32 %v539_v40  ;;  %v509_v60 = vmul.f32 0.020833334, %v441_v14 }
 0x152   : > { %705 = vst.msk [vmem:[%s1290_s25 + $0x18] sm:$0xff] %vm206_vm0, %v673_v56  ;;  %v637_v61 = vmul.f32 %v1276_v58, %v599_v2  ;;  %835 = vrsqrt.f32 %v540_v12  ;;  %v510_v44 = vmul.f32 0.020833334, %v444_v28 }
 0x153   : > { %v826_v22 = vpop.eup %825  ;;  %706 = vst.msk [vmem:[%s1290_s25 + $0x20] sm:$0xff] %vm206_vm0, %v674_v18  ;;  %v638_v5 = vmul.f32 %v1276_v58, %v600_v10  ;;  %v541_v23 = vadd.f32 1e-05, %v509_v60 }
 0x154   : > { %v828_v0 = vpop.eup %827  ;;  %v675_v16 = vadd.f32 %v1282_v6, %v637_v61  ;;  %v601_v55 = vmul.f32 %v826_v22, %v1119_v9  ;;  %v542_v30 = vadd.f32 1e-05, %v510_v44  ;;  %v447_v32 = vpop.xlane.xlu1 %446 }
 0x155   : > { %v450_v34 = vpop.xlane.xlu0 %449  ;;  %v676_v48 = vadd.f32 %v1282_v6, %v638_v5  ;;  %v602_v38 = vmul.f32 %v828_v0, %v1128_v7  ;;  %837 = vrsqrt.f32 %v541_v23  ;;  %v511_v39 = vmul.f32 0.020833334, %v447_v32 }
 0x156   : > { %707 = vst.msk [vmem:[%s1290_s25 + $0x28] sm:$0xff] %vm206_vm0, %v675_v16  ;;  %v639_v42 = vmul.f32 %v1276_v58, %v601_v55  ;;  %839 = vrsqrt.f32 %v542_v30  ;;  %v512_v26 = vmul.f32 0.020833334, %v450_v34 }
 0x157   : > { %v830_v20 = vpop.eup %829  ;;  %708 = vst.msk [vmem:[%s1290_s25 + $0x30] sm:$0xff] %vm206_vm0, %v676_v48  ;;  %v640_v9 = vmul.f32 %v1276_v58, %v602_v38  ;;  %v543_v11 = vadd.f32 1e-05, %v511_v39 }
 0x158   : > { %v832_v46 = vpop.eup %831  ;;  %v677_v36 = vadd.f32 %v1282_v6, %v639_v42  ;;  %v603_v7 = vmul.f32 %v830_v20, %v1131_v13  ;;  %v544_v50 = vadd.f32 1e-05, %v512_v26  ;;  %v453_v52 = vpop.xlane.xlu1 %452 }
 0x159   : > { %v456_v54 = vpop.xlane.xlu0 %455  ;;  %v678_v8 = vadd.f32 %v1282_v6, %v640_v9  ;;  %v604_v24 = vmul.f32 %v832_v46, %v1140_v1  ;;  %841 = vrsqrt.f32 %v543_v11  ;;  %v513_v62 = vmul.f32 0.020833334, %v453_v52 }
 0x15a   : > { %709 = vst.msk [vmem:[%s1290_s25 + $0x38] sm:$0xff] %vm206_vm0, %v677_v36  ;;  %v641_v27 = vmul.f32 %v1276_v58, %v603_v7  ;;  %843 = vrsqrt.f32 %v544_v50  ;;  %v514_v40 = vmul.f32 0.020833334, %v456_v54 }
 0x15b   : > { %v834_v3 = vpop.eup %833  ;;  %710 = vst.msk [vmem:[%s1290_s25 + $0x40] sm:$0xff] %vm206_vm0, %v678_v8  ;;  %v642_v13 = vmul.f32 %v1276_v58, %v604_v24  ;;  %v545_v56 = vadd.f32 1e-05, %v513_v62 }
 0x15c   : > { %v836_v2 = vpop.eup %835  ;;  %v679_v12 = vadd.f32 %v1282_v6, %v641_v27  ;;  %v605_v1 = vmul.f32 %v834_v3, %v1143_v17  ;;  %v546_v14 = vadd.f32 1e-05, %v514_v40  ;;  %v459_v28 = vpop.xlane.xlu1 %458 }
 0x15d   : > { %v462_v18 = vpop.xlane.xlu0 %461  ;;  %v680_v10 = vadd.f32 %v1282_v6, %v642_v13  ;;  %v606_v60 = vmul.f32 %v836_v2, %v1152_v43  ;;  %845 = vrsqrt.f32 %v545_v56  ;;  %v515_v61 = vmul.f32 0.020833334, %v459_v28 }
 0x15e   : > { %711 = vst.msk [vmem:[%s1290_s25 + $0x48] sm:$0xff] %vm206_vm0, %v679_v12  ;;  %v643_v44 = vmul.f32 %v1276_v58, %v605_v1  ;;  %847 = vrsqrt.f32 %v546_v14  ;;  %v516_v22 = vmul.f32 0.020833334, %v462_v18 }
 0x15f   : > { %v838_v5 = vpop.eup %837  ;;  %712 = vst.msk [vmem:[%s1290_s25 + $0x50] sm:$0xff] %vm206_vm0, %v680_v10  ;;  %v644_v17 = vmul.f32 %v1276_v58, %v606_v60  ;;  %v547_v23 = vadd.f32 1e-05, %v515_v61 }
 0x160   : > { %v840_v0 = vpop.eup %839  ;;  %v681_v16 = vadd.f32 %v1282_v6, %v643_v44  ;;  %v607_v43 = vmul.f32 %v838_v5, %v1155_v21  ;;  %v548_v55 = vadd.f32 1e-05, %v516_v22  ;;  %v465_v30 = vpop.xlane.xlu1 %464 }
 0x161   : > { %v468_v32 = vpop.xlane.xlu0 %467  ;;  %v682_v34 = vadd.f32 %v1282_v6, %v644_v17  ;;  %v608_v48 = vmul.f32 %v840_v0, %v1164_v59  ;;  %849 = vrsqrt.f32 %v547_v23  ;;  %v517_v38 = vmul.f32 0.020833334, %v465_v30 }
 0x162   : > { %713 = vst.msk [vmem:[%s1290_s25 + $0x58] sm:$0xff] %vm206_vm0, %v681_v16  ;;  %v645_v39 = vmul.f32 %v1276_v58, %v607_v43  ;;  %851 = vrsqrt.f32 %v548_v55  ;;  %v518_v42 = vmul.f32 0.020833334, %v468_v32 }
 0x163   : > { %v842_v26 = vpop.eup %841  ;;  %714 = vst.msk [vmem:[%s1290_s25 + $0x60] sm:$0xff] %vm206_vm0, %v682_v34  ;;  %v646_v21 = vmul.f32 %v1276_v58, %v608_v48  ;;  %v549_v20 = vadd.f32 1e-05, %v517_v38 }
 0x164   : > { %v844_v9 = vpop.eup %843  ;;  %v683_v11 = vadd.f32 %v1282_v6, %v645_v39  ;;  %v609_v59 = vmul.f32 %v842_v26, %v1167_v25  ;;  %v550_v46 = vadd.f32 1e-05, %v518_v42  ;;  %v471_v36 = vpop.xlane.xlu1 %470 }
 0x165   : > { %v474_v7 = vpop.xlane.xlu0 %473  ;;  %v684_v50 = vadd.f32 %v1282_v6, %v646_v21  ;;  %v610_v52 = vmul.f32 %v844_v9, %v1176_v15  ;;  %853 = vrsqrt.f32 %v549_v20  ;;  %v519_v54 = vmul.f32 0.020833334, %v471_v36 }
 0x166   : > { %715 = vst.msk [vmem:[%s1290_s25 + $0x68] sm:$0xff] %vm206_vm0, %v683_v11  ;;  %v647_v8 = vmul.f32 %v1276_v58, %v609_v59  ;;  %855 = vrsqrt.f32 %v550_v46  ;;  %v520_v24 = vmul.f32 0.020833334, %v474_v7 }
 0x167   : > { %v846_v62 = vpop.eup %845  ;;  %716 = vst.msk [vmem:[%s1290_s25 + $0x70] sm:$0xff] %vm206_vm0, %v684_v50  ;;  %v648_v25 = vmul.f32 %v1276_v58, %v610_v52  ;;  %v551_v27 = vadd.f32 1e-05, %v519_v54 }
 0x168   : > { %v848_v40 = vpop.eup %847  ;;  %v685_v3 = vadd.f32 %v1282_v6, %v647_v8  ;;  %v611_v15 = vmul.f32 %v846_v62, %v1179_v29  ;;  %v552_v13 = vadd.f32 1e-05, %v520_v24  ;;  %v477_v56 = vpop.xlane.xlu1 %476 }
 0x169   : > { %v480_v2 = vpop.xlane.xlu0 %479  ;;  %v686_v12 = vadd.f32 %v1282_v6, %v648_v25  ;;  %v612_v1 = vmul.f32 %v848_v40, %v1188_v31  ;;  %857 = vrsqrt.f32 %v551_v27  ;;  %v521_v14 = vmul.f32 0.020833334, %v477_v56 }
 0x16a   : > { %717 = vst.msk [vmem:[%s1290_s25 + $0x78] sm:$0xff] %vm206_vm0, %v685_v3  ;;  %v649_v28 = vmul.f32 %v1276_v58, %v611_v15  ;;  %859 = vrsqrt.f32 %v552_v13  ;;  %v522_v18 = vmul.f32 0.020833334, %v480_v2 }
 0x16b   : > { %v850_v10 = vpop.eup %849  ;;  %718 = vst.msk [vmem:[%s1290_s25 + $0x80] sm:$0xff] %vm206_vm0, %v686_v12  ;;  %v650_v29 = vmul.f32 %v1276_v58, %v612_v1  ;;  %v553_v60 = vadd.f32 1e-05, %v521_v14 }
 0x16c   : > { %v852_v61 = vpop.eup %851  ;;  %v687_v44 = vadd.f32 %v1282_v6, %v649_v28  ;;  %v613_v31 = vmul.f32 %v850_v10, %v1191_v33  ;;  %v554_v22 = vadd.f32 1e-05, %v522_v18  ;;  %v483_v5 = vpop.xlane.xlu1 %482 }
 0x16d   : > { %v486_v17 = vpop.xlane.xlu0 %485  ;;  %v688_v23 = vadd.f32 %v1282_v6, %v650_v29  ;;  %v614_v0 = vmul.f32 %v852_v61, %v1200_v47  ;;  %861 = vrsqrt.f32 %v553_v60  ;;  %v523_v16 = vmul.f32 0.020833334, %v483_v5 }
 0x16e   : > { %719 = vst.msk [vmem:[%s1290_s25 + $0x88] sm:$0xff] %vm206_vm0, %v687_v44  ;;  %v651_v43 = vmul.f32 %v1276_v58, %v613_v31  ;;  %863 = vrsqrt.f32 %v554_v22  ;;  %v524_v55 = vmul.f32 0.020833334, %v486_v17 }
 0x16f   : > { %v854_v30 = vpop.eup %853  ;;  %720 = vst.msk [vmem:[%s1290_s25 + $0x90] sm:$0xff] %vm206_vm0, %v688_v23  ;;  %v652_v33 = vmul.f32 %v1276_v58, %v614_v0  ;;  %v555_v32 = vadd.f32 1e-05, %v523_v16 }
 0x170   : > { %v856_v34 = vpop.eup %855  ;;  %v689_v48 = vadd.f32 %v1282_v6, %v651_v43  ;;  %v615_v47 = vmul.f32 %v854_v30, %v1203_v37  ;;  %v556_v38 = vadd.f32 1e-05, %v524_v55  ;;  %v489_v39 = vpop.xlane.xlu1 %488 }
 0x171   : > { %v492_v42 = vpop.xlane.xlu0 %491  ;;  %v690_v26 = vadd.f32 %v1282_v6, %v652_v33  ;;  %v616_v21 = vmul.f32 %v856_v34, %v1212_v63  ;;  %865 = vrsqrt.f32 %v555_v32  ;;  %v525_v20 = vmul.f32 0.020833334, %v489_v39 }
 0x172   : > { %721 = vst.msk [vmem:[%s1290_s25 + $0x98] sm:$0xff] %vm206_vm0, %v689_v48  ;;  %v653_v9 = vmul.f32 %v1276_v58, %v615_v47  ;;  %867 = vrsqrt.f32 %v556_v38  ;;  %v526_v11 = vmul.f32 0.020833334, %v492_v42 }
 0x173   : > { %v858_v59 = vpop.eup %857  ;;  %722 = vst.msk [vmem:[%s1290_s25 + $0xa0] sm:$0xff] %vm206_vm0, %v690_v26  ;;  %v654_v37 = vmul.f32 %v1276_v58, %v616_v21  ;;  %v557_v46 = vadd.f32 1e-05, %v525_v20 }
 0x174   : > { %v860_v36 = vpop.eup %859  ;;  %v691_v7 = vadd.f32 %v1282_v6, %v653_v9  ;;  %v617_v63 = vmul.f32 %v858_v59, %v1215_v41  ;;  %v558_v50 = vadd.f32 1e-05, %v526_v11  ;;  %v495_v52 = vpop.xlane.xlu1 %494 }
 0x175   : > { %v692_v54 = vadd.f32 %v1282_v6, %v654_v37  ;;  %v618_v8 = vmul.f32 %v860_v36, %v1224_v19  ;;  %869 = vrsqrt.f32 %v557_v46  ;;  %v527_v24 = vmul.f32 0.020833334, %v495_v52 }
 0x176   : > { %723 = vst.msk [vmem:[%s1290_s25 + $0xa8] sm:$0xff] %vm206_vm0, %v691_v7  ;;  %v655_v62 = vmul.f32 %v1276_v58, %v617_v63  ;;  %871 = vrsqrt.f32 %v558_v50 }
 0x177   : > { %v862_v25 = vpop.eup %861  ;;  %724 = vst.msk [vmem:[%s1290_s25 + $0xb0] sm:$0xff] %vm206_vm0, %v692_v54  ;;  %v656_v41 = vmul.f32 %v1276_v58, %v618_v8  ;;  %v559_v27 = vadd.f32 1e-05, %v527_v24 }
 0x178   : > { %v864_v40 = vpop.eup %863  ;;  %v693_v3 = vadd.f32 %v1282_v6, %v655_v62  ;;  %v619_v19 = vmul.f32 %v862_v25, %v1227_v45 }
 0x179   : > { %v694_v15 = vadd.f32 %v1282_v6, %v656_v41  ;;  %v620_v13 = vmul.f32 %v864_v40, %v1236_v35  ;;  %873 = vrsqrt.f32 %v559_v27 }
 0x17a   : > { %725 = vst.msk [vmem:[%s1290_s25 + $0xb8] sm:$0xff] %vm206_vm0, %v693_v3  ;;  %v657_v56 = vmul.f32 %v1276_v58, %v619_v19 }
 0x17b   : > { %v866_v2 = vpop.eup %865  ;;  %726 = vst.msk [vmem:[%s1290_s25 + $0xc0] sm:$0xff] %vm206_vm0, %v694_v15  ;;  %v658_v12 = vmul.f32 %v1276_v58, %v620_v13 }
 0x17c   : > { %v868_v1 = vpop.eup %867  ;;  %v695_v14 = vadd.f32 %v1282_v6, %v657_v56  ;;  %v621_v45 = vmul.f32 %v866_v2, %v1239_v49 }
 0x17d   : > { %v696_v28 = vadd.f32 %v1282_v6, %v658_v12  ;;  %v622_v35 = vmul.f32 %v868_v1, %v1248_v51 }
 0x17e   : > { %727 = vst.msk [vmem:[%s1290_s25 + $0xc8] sm:$0xff] %vm206_vm0, %v695_v14  ;;  %v659_v18 = vmul.f32 %v1276_v58, %v621_v45 }
 0x17f   : > { %v870_v10 = vpop.eup %869  ;;  %728 = vst.msk [vmem:[%s1290_s25 + $0xd0] sm:$0xff] %vm206_vm0, %v696_v28  ;;  %v660_v29 = vmul.f32 %v1276_v58, %v622_v35 }
 0x180   : > { %v872_v60 = vpop.eup %871  ;;  %v697_v61 = vadd.f32 %v1282_v6, %v659_v18  ;;  %v623_v49 = vmul.f32 %v870_v10, %v1251_v53 }
 0x181   : > { %v698_v44 = vadd.f32 %v1282_v6, %v660_v29  ;;  %v624_v51 = vmul.f32 %v872_v60, %v1260_v4 }
 0x182   : > { %729 = vst.msk [vmem:[%s1290_s25 + $0xd8] sm:$0xff] %vm206_vm0, %v697_v61  ;;  %v661_v31 = vmul.f32 %v1276_v58, %v623_v49 }
 0x183   : > { %v874_v22 = vpop.eup %873  ;;  %730 = vst.msk [vmem:[%s1290_s25 + $0xe0] sm:$0xff] %vm206_vm0, %v698_v44  ;;  %v662_v5 = vmul.f32 %v1276_v58, %v624_v51 }
 0x184   : > { %v699_v17 = vadd.f32 %v1282_v6, %v661_v31  ;;  %v625_v23 = vmul.f32 %v874_v22, %v1263_v57 }
 0x185   : > { %v700_v0 = vadd.f32 %v1282_v6, %v662_v5 }
 0x186   : > { %731 = vst.msk [vmem:[%s1290_s25 + $0xe8] sm:$0xff] %vm206_vm0, %v699_v17  ;;  %v663_v53 = vmul.f32 %v1276_v58, %v625_v23 }
 0x187   : > { %732 = vst.msk [vmem:[%s1290_s25 + $0xf0] sm:$0xff] %vm206_vm0, %v700_v0 }
 0x188   : > { %v701_v4 = vadd.f32 %v1282_v6, %v663_v53 }
 0x18a   : > { %733 = vst.msk [vmem:[%s1290_s25 + $0xf8] sm:$0xff] %vm206_vm0, %v701_v4 }
 0x18b PF: > { %s13_s12 = sadd.s32 1, %s881_s12  }
 0x18c   : > { %p10_p4 = scmp.ge.s32.totalorder %s13_s12, 4  }
 0x18e   :  { %12 = sbr.rel (!%p10_p4) target bundleno = 1 (0x1), region = 62 }

</bundles_post_ra>
